<compile_context>
chip_gen: v7x
topology: tpu7x:2x2x1
jax: 0.10.0
libtpu: 0.0.40
codegen_flags: <defaults>
</compile_context>

<pallas_src>
from functools import partial

import jax
import jax.numpy as jnp
from jax.experimental import pallas as pl
from jax.experimental.pallas import tpu as pltpu


# ---------------------------------------------------------------------------
# Tile-size helpers (mem-bound op: aim for ~2 MiB blocks so double-buffered
# in+out stays well under the 16/32 MiB scoped-VMEM defaults on v5e/v6e/v7x,
# while keeping the grid deep enough to shard across v7x's 2 TensorCores).
# ---------------------------------------------------------------------------
_TARGET_BLOCK_BYTES = 2 * 1024 * 1024


def _sublane_multiple(dtype):
    itemsize = jnp.dtype(dtype).itemsize
    if itemsize >= 4:
        return 8
    if itemsize == 2:
        return 16
    return 32


def _choose_row_tile(n_rows, c, dtype, max_rows=2048):
    """Row tile for the channels_last kernel."""
    itemsize = jnp.dtype(dtype).itemsize
    sub = _sublane_multiple(dtype)
    tm = _TARGET_BLOCK_BYTES // max(1, c * itemsize)
    tm = max(sub, (tm // sub) * sub)
    tm = min(tm, max_rows)
    if tm >= n_rows:
        return n_rows  # single full block (block dim == array dim is always legal)
    return tm


def _choose_lane_tile(t, c, dtype, max_lanes=4096):
    """T tile for the channels_first kernel (multiple of 128 unless full)."""
    itemsize = jnp.dtype(dtype).itemsize
    tt = _TARGET_BLOCK_BYTES // max(1, c * itemsize)
    tt = max(128, (tt // 128) * 128)
    tt = min(tt, max_lanes)
    if tt >= t:
        return t
    return tt


# ---------------------------------------------------------------------------
# Kernels
# ---------------------------------------------------------------------------
def _ln_channels_last_kernel(x_ref, w_ref, b_ref, o_ref, *, eps, inv_c):
    x = x_ref[...].astype(jnp.float32)                        # (TM, C)
    mean = jnp.sum(x, axis=-1, keepdims=True) * inv_c         # (TM, 1)
    msq = jnp.sum(x * x, axis=-1, keepdims=True) * inv_c      # E[x^2]
    var = jnp.maximum(msq - mean * mean, 0.0)                 # biased variance
    inv = jax.lax.rsqrt(var + eps)
    w = w_ref[...].astype(jnp.float32)                        # (1, C)
    b = b_ref[...].astype(jnp.float32)
    o_ref[...] = ((x - mean) * inv * w + b).astype(o_ref.dtype)


def _ln_channels_first_kernel(x_ref, w_ref, b_ref, o_ref, *, eps, inv_c):
    x = x_ref[0].astype(jnp.float32)                          # (C, TT)
    mean = jnp.sum(x, axis=0, keepdims=True) * inv_c          # (1, TT)
    msq = jnp.sum(x * x, axis=0, keepdims=True) * inv_c
    var = jnp.maximum(msq - mean * mean, 0.0)
    inv = jax.lax.rsqrt(var + eps)
    w = w_ref[...].astype(jnp.float32)                        # (C, 1)
    b = b_ref[...].astype(jnp.float32)
    o_ref[0] = ((x - mean) * inv * w + b).astype(o_ref.dtype)


# ---------------------------------------------------------------------------
# pallas_call wrappers
# ---------------------------------------------------------------------------
def _layernorm_channels_last_2d(x2d, weight, bias, eps, *, tm=None):
    n, c = x2d.shape
    if tm is None:
        tm = _choose_row_tile(n, c, x2d.dtype)
    w2 = weight.reshape(1, c)
    b2 = bias.reshape(1, c)
    return pl.pallas_call(
        partial(_ln_channels_last_kernel, eps=eps, inv_c=1.0 / c),
        out_shape=jax.ShapeDtypeStruct((n, c), x2d.dtype),
        grid_spec=pltpu.PrefetchScalarGridSpec(
            num_scalar_prefetch=0,
            grid=(pl.cdiv(n, tm),),
            in_specs=[
                pl.BlockSpec((tm, c), lambda i: (i, 0)),
                pl.BlockSpec((1, c), lambda i: (0, 0)),
                pl.BlockSpec((1, c), lambda i: (0, 0)),
            ],
            out_specs=pl.BlockSpec((tm, c), lambda i: (i, 0)),
        ),
        compiler_params=pltpu.CompilerParams(
            dimension_semantics=("parallel",),
        ),
    )(x2d, w2, b2)


def _layernorm_channels_first(x, weight, bias, eps, *, tt=None):
    bsz, c, t = x.shape
    if tt is None:
        tt = _choose_lane_tile(t, c, x.dtype)
    w2 = weight.reshape(c, 1)
    b2 = bias.reshape(c, 1)
    return pl.pallas_call(
        partial(_ln_channels_first_kernel, eps=eps, inv_c=1.0 / c),
        out_shape=jax.ShapeDtypeStruct((bsz, c, t), x.dtype),
        grid_spec=pltpu.PrefetchScalarGridSpec(
            num_scalar_prefetch=0,
            grid=(bsz, pl.cdiv(t, tt)),
            in_specs=[
                pl.BlockSpec((1, c, tt), lambda bi, ti: (bi, 0, ti)),
                pl.BlockSpec((c, 1), lambda bi, ti: (0, 0)),
                pl.BlockSpec((c, 1), lambda bi, ti: (0, 0)),
            ],
            out_specs=pl.BlockSpec((1, c, tt), lambda bi, ti: (bi, 0, ti)),
        ),
        compiler_params=pltpu.CompilerParams(
            dimension_semantics=("parallel", "parallel"),
        ),
    )(x, w2, b2)


def layer_norm(x, weight, bias, eps=1e-6, data_format="channels_last"):
    """Forward pass of the ConvNeXt-style LayerNorm module.

    channels_last : x shape (..., C), normalized over the last dim.
    channels_first: x shape (B, C, T) (Conv1d layout), normalized over dim 1,
                    affine broadcast as weight[:, None] / bias[:, None].
    """
    if data_format == "channels_last":
        c = x.shape[-1]
        lead = x.shape[:-1]
        y2d = _layernorm_channels_last_2d(x.reshape(-1, c), weight, bias, eps)
        return y2d.reshape(*lead, c)
    elif data_format == "channels_first":
        return _layernorm_channels_first(x, weight, bias, eps)
    else:
        raise NotImplementedError(data_format)


# ---------------------------------------------------------------------------
# Pure-JAX references (match the torch module)
# ---------------------------------------------------------------------------
def _reference_channels_last(x, w, b, eps):
    mean = jnp.mean(x, axis=-1, keepdims=True)
    var = jnp.mean((x - mean) ** 2, axis=-1, keepdims=True)
    return (x - mean) / jnp.sqrt(var + eps) * w + b


def _reference_channels_first(x, w, b, eps):
    u = jnp.mean(x, axis=1, keepdims=True)
    s = jnp.mean((x - u) ** 2, axis=1, keepdims=True)
    xn = (x - u) / jnp.sqrt(s + eps)
    return w[:, None] * xn + b[:, None]


if __name__ == "__main__":
    key = jax.random.PRNGKey(0)
    k1, k2, k3, k4, k5, k6 = jax.random.split(key, 6)

    C = 32
    eps = 1e-6

    # Module __init__ gives ones/zeros; perturb to exercise the affine path.
    weight = jnp.ones((C,), jnp.float32) + 0.1 * jax.random.normal(k3, (C,), jnp.float32)
    bias = jnp.zeros((C,), jnp.float32) + 0.1 * jax.random.normal(k4, (C,), jnp.float32)

    # channels_last input: (batch=2, seq=8, hidden=32)
    x_last = jax.random.normal(k1, (2, 8, C), jnp.float32)
    y_last = jax.block_until_ready(
        layer_norm(x_last, weight, bias, eps, data_format="channels_last"))
    ref_last = _reference_channels_last(x_last, weight, bias, eps)
    assert jnp.allclose(y_last, ref_last, atol=1e-5, rtol=1e-5), "channels_last mismatch"

    # channels_first input (Conv1d NCT): (batch=2, channels=32, time=16)
    x_first = jax.random.normal(k2, (2, C, 16), jnp.float32)
    y_first = jax.block_until_ready(
        layer_norm(x_first, weight, bias, eps, data_format="channels_first"))
    ref_first = _reference_channels_first(x_first, weight, bias, eps)
    assert jnp.allclose(y_first, ref_first, atol=1e-5, rtol=1e-5), "channels_first mismatch"

    # Exercise the masked partial-block path (no padding copy) for both layouts.
    x_part = jax.random.normal(k5, (20, C), jnp.float32)          # 20 rows, tm=8 -> partial block
    y_part = jax.block_until_ready(
        _layernorm_channels_last_2d(x_part, weight, bias, eps, tm=8))
    ref_part = _reference_channels_last(x_part, weight, bias, eps)
    assert jnp.allclose(y_part, ref_part, atol=1e-5, rtol=1e-5), "partial-row-block mismatch"

    x_cf_part = jax.random.normal(k6, (2, C, 200), jnp.float32)   # T=200, tt=128 -> partial block
    y_cf_part = jax.block_until_ready(
        _layernorm_channels_first(x_cf_part, weight, bias, eps, tt=128))
    ref_cf_part = _reference_channels_first(x_cf_part, weight, bias, eps)
    assert jnp.allclose(y_cf_part, ref_cf_part, atol=1e-5, rtol=1e-5), "partial-lane-block mismatch"

    print("KERNEL_OK")
</pallas_src>

<mosaic_0001>
module attributes {stable_mosaic.version = 11 : i64} {
  func.func @_ln_channels_last_kernel(%arg0: i32, %arg1: memref<16x32xf32, #tpu.memory_space<vmem>>, %arg2: memref<1x32xf32, #tpu.memory_space<vmem>>, %arg3: memref<1x32xf32, #tpu.memory_space<vmem>>, %arg4: memref<16x32xf32, #tpu.memory_space<vmem>>) attributes {dimension_semantics = [#tpu.dimension_semantics<parallel>], iteration_bounds = array<i64: 1>, scalar_prefetch = 0 : i64, scratch_operands = 0 : i64, tpu.core_type = #tpu.core_type<tc>, window_params = [{transform_indices = @transform_0, window_bounds = array<i64: 16, 32>}, {pipeline_mode = #tpu.pipeline_mode<synchronous>, transform_indices = @transform_1, window_bounds = array<i64: 1, 32>}, {pipeline_mode = #tpu.pipeline_mode<synchronous>, transform_indices = @transform_2, window_bounds = array<i64: 1, 32>}, {transform_indices = @transform_3, window_bounds = array<i64: 16, 32>}]} {
    %c0 = arith.constant 0 : index
    %c0_0 = arith.constant 0 : index
    %0 = vector.load %arg1[%c0, %c0_0] : memref<16x32xf32, #tpu.memory_space<vmem>>, vector<16x32xf32>
    %cst = arith.constant dense<0.000000e+00> : vector<16xf32>
    %1 = vector.multi_reduction <add>, %0, %cst [1] : vector<16x32xf32> to vector<16xf32>
    %2 = vector.shape_cast %1 : vector<16xf32> to vector<16x1xf32>
    %cst_1 = arith.constant 3.125000e-02 : f32
    %3 = vector.broadcast %cst_1 : f32 to vector<16x1xf32>
    %4 = arith.mulf %2, %3 : vector<16x1xf32>
    %5 = arith.mulf %0, %0 : vector<16x32xf32>
    %cst_2 = arith.constant dense<0.000000e+00> : vector<16xf32>
    %6 = vector.multi_reduction <add>, %5, %cst_2 [1] : vector<16x32xf32> to vector<16xf32>
    %7 = vector.shape_cast %6 : vector<16xf32> to vector<16x1xf32>
    %cst_3 = arith.constant 3.125000e-02 : f32
    %8 = vector.broadcast %cst_3 : f32 to vector<16x1xf32>
    %9 = arith.mulf %7, %8 : vector<16x1xf32>
    %10 = arith.mulf %4, %4 : vector<16x1xf32>
    %11 = arith.subf %9, %10 : vector<16x1xf32>
    %cst_4 = arith.constant 0.000000e+00 : f32
    %12 = vector.broadcast %cst_4 : f32 to vector<16x1xf32>
    %13 = arith.maximumf %11, %12 : vector<16x1xf32>
    %cst_5 = arith.constant 9.99999997E-7 : f32
    %14 = vector.broadcast %cst_5 : f32 to vector<16x1xf32>
    %15 = arith.addf %13, %14 : vector<16x1xf32>
    %16 = math.rsqrt %15 : vector<16x1xf32>
    %c0_6 = arith.constant 0 : index
    %c0_7 = arith.constant 0 : index
    %17 = vector.load %arg2[%c0_6, %c0_7] : memref<1x32xf32, #tpu.memory_space<vmem>>, vector<1x32xf32>
    %c0_8 = arith.constant 0 : index
    %c0_9 = arith.constant 0 : index
    %18 = vector.load %arg3[%c0_8, %c0_9] : memref<1x32xf32, #tpu.memory_space<vmem>>, vector<1x32xf32>
    %19 = vector.broadcast %4 : vector<16x1xf32> to vector<16x32xf32>
    %20 = arith.subf %0, %19 : vector<16x32xf32>
    %21 = vector.broadcast %16 : vector<16x1xf32> to vector<16x32xf32>
    %22 = arith.mulf %20, %21 : vector<16x32xf32>
    %23 = vector.broadcast %17 : vector<1x32xf32> to vector<16x32xf32>
    %24 = arith.mulf %22, %23 : vector<16x32xf32>
    %25 = vector.broadcast %18 : vector<1x32xf32> to vector<16x32xf32>
    %26 = arith.addf %24, %25 : vector<16x32xf32>
    %c0_10 = arith.constant 0 : index
    %c0_11 = arith.constant 0 : index
    %27 = vector.load %arg4[%c0_10, %c0_11] : memref<16x32xf32, #tpu.memory_space<vmem>>, vector<16x32xf32>
    tpu.vector_store %arg4[%c0_10, %c0_11], %26 {strides = array<i32>} : memref<16x32xf32, #tpu.memory_space<vmem>>, vector<16x32xf32>,
    return
  }
  func.func @transform_0(%arg0: i32) -> (i32, i32) {
    %c0_i32 = arith.constant 0 : i32
    %c0_i32_0 = arith.constant 0 : i32
    return %arg0, %c0_i32 : i32, i32
  }
  func.func @transform_1(%arg0: i32) -> (i32, i32) {
    %c0_i32 = arith.constant 0 : i32
    %c0_i32_0 = arith.constant 0 : i32
    %c0_i32_1 = arith.constant 0 : i32
    return %c0_i32, %c0_i32_0 : i32, i32
  }
  func.func @transform_2(%arg0: i32) -> (i32, i32) {
    %c0_i32 = arith.constant 0 : i32
    %c0_i32_0 = arith.constant 0 : i32
    %c0_i32_1 = arith.constant 0 : i32
    return %c0_i32, %c0_i32_0 : i32, i32
  }
  func.func @transform_3(%arg0: i32) -> (i32, i32) {
    %c0_i32 = arith.constant 0 : i32
    %c0_i32_0 = arith.constant 0 : i32
    return %arg0, %c0_i32 : i32, i32
  }
}

</mosaic_0001>

<bundles_post_ra>
// kernel: tpu_custom_call.1
= control target key start
LH: loop header
LB: loop body
LE: loop exit
PB: predicated region body
PF: predicated region fallthrough
CT: control target
= control target key end

     0   :  { %8 = vsyncpa [#allocation3], 0  ;;  %s225_s0 = inlined_call_operand.hbm [shape: f32[16,32], index: 0, kind: input, shape index: {}]   ;;  %s226_s1 = inlined_call_operand.vmem [shape: f32[1,32], index: 1, kind: input, shape index: {}]   ;;  %s227_s2 = inlined_call_operand.vmem [shape: f32[1,32], index: 2, kind: input, shape index: {}]   ;;  %s228_s3 = inlined_call_operand.hbm [shape: f32[16,32], index: 3, kind: output, shape index: {}]  }
   0x1   :  { %9 = vsyncpa [#allocation4], 0  ;;  %s159_s12 = smov [#allocation2]   ;;  %s111_s16 = scalar_lea.hbm %s225_s0, 256 }
   0x2   :  { %s15_s13 = sshll.u32 %s159_s12, 4  ;;  %p112_p0 = scmp.ne.s32.totalorder %s225_s0, %s111_s16  ;;  %s16_s13 = int_to_ptr.vmem [resolvable:$true] %s15_s13 }
   0x3   :  { %p115_p1 = scmp.lt.u32.totalorder %s111_s16, %s225_s0 }
   0x5   :  { %p117_p2 = pnand %p115_p1, %p112_p0 }
   0x7   :  { %120 = shalt.err (!%p117_p2)
}
   0x8   :  { %s121_s21 = scalar_lea.vmem %s16_s13, 256  ;;  %p126_p4 = scmp.lt.s32.totalorder %s16_s13, %s16_s13 }
   0x9   :  { %p122_p3 = scmp.ne.s32.totalorder %s16_s13, %s121_s21  ;;  %p127_p5 = scmp.lt.s32.totalorder %s121_s21, %s121_s21 }
   0xb   :  { %p128_p6 = por %p127_p5, %p126_p4 }
   0xd   :  { %p129_p7 = pnand %p128_p6, %p122_p3 }
   0xf   :  { %132 = shalt.err (!%p129_p7)
}
  0x10   :  { %s160_s22 = smov 128   ;;  %s161_s23 = smov 8  }
  0x11   :  { %21 = dma.hbm_to_vmem [thread:$0]  %s225_s0, 256, %s16_s13, [#allocation3], %s160_s22, %s160_s22, %s161_s23  }
  0x12   :  { %155 = dma.done.wait [#allocation3], 256  }
  0x13   :  { %156 = vsyncadd [#allocation3], 4294967040  ;;  %vm31_vm0 = vcmask 261120   ;;  %v29_v0 = vld [vmem:[#allocation2] sm:$0xff]  ;;  %v30_v1 = vld [vmem:[#allocation2 + $0x8] sm:$0xff]  ;;  %s162_s29 = smov [#allocation5]  }
  0x14   :  { %v32_v2 = vsel %vm31_vm0, %v29_v0, 0.0  ;;  %v40_v3 = vmul.f32 %v29_v0, %v29_v0  ;;  %v41_v4 = vmul.f32 %v30_v1, %v30_v1  ;;  %v35_v6 = vsel %vm31_vm0, %v30_v1, 0.0  ;;  %v101_v26 = vld [vmem:[%s226_s1] ss:$0 sm:$0xff]  ;;  %s89_s30 = sshll.u32 %s162_s29, 4  ;;  %s90_s30 = int_to_ptr.vmem [resolvable:$true] %s89_s30 }
  0x15   :  { %33 = vadd.xlane.f32.xlu0 %v32_v2  ;;  %v102_v28 = vld [vmem:[%s227_s2] ss:$0 sm:$0xff]  ;;  %s133_s1 = scalar_lea.vmem %s90_s30, 256  ;;  %p138_p9 = scmp.lt.s32.totalorder %s90_s30, %s90_s30 }
  0x16   :  { %v42_v5 = vsel %vm31_vm0, %v40_v3, 0.0  ;;  %v45_v7 = vsel %vm31_vm0, %v41_v4, 0.0  ;;  %p134_p8 = scmp.ne.s32.totalorder %s90_s30, %s133_s1  ;;  %p139_p10 = scmp.lt.s32.totalorder %s133_s1, %s133_s1 }
  0x17   :  { %43 = vadd.xlane.f32.xlu1 %v42_v5 }
  0x18   :  { %p140_p11 = por %p139_p10, %p138_p9 }
  0x19   :  { %36 = vadd.xlane.f32.xlu0 %v35_v6 }
  0x1a   :  { %p141_p12 = pnand %p140_p11, %p134_p8 }
  0x1b   :  { %46 = vadd.xlane.f32.xlu1 %v45_v7 }
  0xa2   :  { %v34_v8 = vpop.xlane.xlu0 %33 }
  0xa3   :  { %v38_v9 = vmul.f32 0.03125, %v34_v8 }
  0xa4   :  { %v44_v10 = vpop.xlane.xlu1 %43 }
  0xa5   :  { %v50_v11 = vmul.f32 %v38_v9, %v38_v9  ;;  %v48_v12 = vmul.f32 0.03125, %v44_v10  ;;  %v62_v24 = vsub.f32 %v29_v0, %v38_v9 }
  0xa6   :  { %v37_v13 = vpop.xlane.xlu0 %36 }
  0xa7   :  { %v52_v14 = vsub.f32 %v48_v12, %v50_v11  ;;  %v39_v15 = vmul.f32 0.03125, %v37_v13 }
  0xa8   :  { %v47_v16 = vpop.xlane.xlu1 %46 }
  0xa9   :  { %v54_v17 = vmax.f32 %v52_v14, 0.0  ;;  %v51_v18 = vmul.f32 %v39_v15, %v39_v15  ;;  %v49_v19 = vmul.f32 0.03125, %v47_v16  ;;  %v63_v29 = vsub.f32 %v30_v1, %v39_v15 }
  0xab   :  { %v56_v20 = vadd.f32 1e-06, %v54_v17  ;;  %v53_v21 = vsub.f32 %v49_v19, %v51_v18 }
  0xad   :  { %107 = vrsqrt.f32 %v56_v20  ;;  %v55_v22 = vmax.f32 %v53_v21, 0.0 }
  0xaf   :  { %v57_v23 = vadd.f32 1e-06, %v55_v22 }
  0xb1   :  { %109 = vrsqrt.f32 %v57_v23 }
  0xb7   :  { %v108_v25 = vpop.eup %107 }
  0xb8   :  { %v64_v27 = vmul.f32 %v108_v25, %v62_v24 }
  0xba   :  { %v72_v30 = vmul.f32 %v101_v26, %v64_v27 }
  0xbb   :  { %v110_v31 = vpop.eup %109 }
  0xbc   :  { %v65_v32 = vmul.f32 %v110_v31, %v63_v29  ;;  %v80_v33 = vadd.f32 %v102_v28, %v72_v30 }
  0xbe   :  { %v73_v34 = vmul.f32 %v101_v26, %v65_v32  ;;  %82 = vst.msk [vmem:[#allocation5] sm:$0xff] %vm31_vm0, %v80_v33 }
  0xc0   :  { %v81_v35 = vadd.f32 %v102_v28, %v73_v34 }
  0xc2   :  { %83 = vst.msk [vmem:[#allocation5 + $0x8] sm:$0xff] %vm31_vm0, %v81_v35 }
  0xc3   :  { %144 = shalt.err (!%p141_p12)
}
  0xc4   :  { %s145_s5 = scalar_lea.hbm %s228_s3, 256 }
  0xc5   :  { %p146_p13 = scmp.ne.s32.totalorder %s228_s3, %s145_s5  ;;  %p149_p0 = scmp.lt.u32.totalorder %s145_s5, %s228_s3 }
  0xc7   :  { %p151_p1 = pnand %p149_p0, %p146_p13 }
  0xc9   :  { %154 = shalt.err (!%p151_p1)
}
  0xca   :  { %95 = dma.vmem_to_hbm [thread:$0]  %s90_s30, 256, %s228_s3, [#allocation4], %s160_s22, %s160_s22, %s161_s23  }
  0xcb   :  { %157 = dma.done.wait [#allocation4], 256  }
  0xcc   :  { %158 = vsyncadd [#allocation4], 4294967040 }
  0xcd   :  { %99 = vsyncpa [#allocation3], 1 }
  0xce   :  { %100 = vsyncpa [#allocation4], 1 }

</bundles_post_ra>
